<compile_context>
chip_gen: v7x
topology: tpu7x:2x2x1
jax: 0.10.0
libtpu: 0.0.40
codegen_flags: <defaults>
</compile_context>

<pallas_src>
import functools

import jax
import jax.numpy as jnp
from jax.experimental import pallas as pl
from jax.experimental.pallas import tpu as pltpu

HIDDEN1 = 64
HIDDEN2 = 32


def mlp_kernel(xT_ref, w1_ref, b1_ref, w2_ref, b2_ref, w3_ref, b3_ref, o_ref):
    # fc1 + ReLU : (64, F) @ (F, TILE_B) -> (64, TILE_B), f32 accumulate
    h1 = jnp.dot(w1_ref[...], xT_ref[...], preferred_element_type=jnp.float32)
    h1 = jnp.maximum(h1 + b1_ref[...], 0.0)

    # fc2 + ReLU : (32, 64) @ (64, TILE_B) -> (32, TILE_B)
    h2 = jnp.dot(w2_ref[...], h1.astype(jnp.bfloat16),
                 preferred_element_type=jnp.float32)
    h2 = jnp.maximum(h2 + b2_ref[...], 0.0)

    # fc3 (out_features=1): VPU multiply + sublane (XLU) reduction instead of an
    # N=1 MXU matmul; result is lane-dense (1, TILE_B).
    out = jnp.sum(w3_ref[...] * h2, axis=0, keepdims=True) + b3_ref[...]
    o_ref[...] = out.astype(o_ref.dtype)


@functools.partial(jax.jit, static_argnames=("tile_b",))
def water_consumption_nn(x, params, tile_b=1024):
    """x: [B, F] float32. params: PyTorch-layout weights (w: [out, in], b: [out])."""
    B, F = x.shape

    # Batch tile: multiple of 128 lanes, capped at tile_b, no bigger than needed.
    tb = max(128, min(tile_b, pl.cdiv(B, 128) * 128))
    b_pad = pl.cdiv(B, tb) * tb
    grid = (b_pad // tb,)

    # Transpose so batch lives on the lane axis; bf16 halves HBM traffic for x.
    x_pad = jnp.pad(x, ((0, b_pad - B), (0, 0)))
    xT = x_pad.T.astype(jnp.bfloat16)                      # (F, b_pad)

    w1 = params["w1"].astype(jnp.bfloat16)                 # (64, F)
    b1 = params["b1"].reshape(HIDDEN1, 1)                  # (64, 1) f32
    w2 = params["w2"].astype(jnp.bfloat16)                 # (32, 64)
    b2 = params["b2"].reshape(HIDDEN2, 1)                  # (32, 1) f32
    w3 = params["w3"].reshape(HIDDEN2, 1)                  # (32, 1) f32 (VPU path)
    b3 = params["b3"].reshape(1, 1)                        # (1, 1)  f32

    resident = lambda i: (0, 0)  # weights/biases stay pinned in VMEM

    outT = pl.pallas_call(
        mlp_kernel,
        out_shape=jax.ShapeDtypeStruct((1, b_pad), jnp.float32),
        grid=grid,
        in_specs=[
            pl.BlockSpec((F, tb), lambda i: (0, i)),        # streamed x tile
            pl.BlockSpec((HIDDEN1, F), resident),
            pl.BlockSpec((HIDDEN1, 1), resident),
            pl.BlockSpec((HIDDEN2, HIDDEN1), resident),
            pl.BlockSpec((HIDDEN2, 1), resident),
            pl.BlockSpec((HIDDEN2, 1), resident),
            pl.BlockSpec((1, 1), resident),
        ],
        out_specs=pl.BlockSpec((1, tb), lambda i: (0, i)),  # lane-dense output
        compiler_params=pltpu.CompilerParams(
            dimension_semantics=("parallel",)),             # v7x: shard tiles over 2 TCs
    )(xT, w1, b1, w2, b2, w3, b3)

    return outT[0, :B].reshape(B, 1)


def init_params(key, in_features):
    """PyTorch nn.Linear default init (U[-1/sqrt(fan_in), 1/sqrt(fan_in)]), torch layout."""
    dims = [(in_features, HIDDEN1), (HIDDEN1, HIDDEN2), (HIDDEN2, 1)]
    keys = jax.random.split(key, 2 * len(dims))
    params = {}
    for i, (fan_in, fan_out) in enumerate(dims):
        bound = 1.0 / jnp.sqrt(jnp.float32(fan_in))
        w = jax.random.uniform(keys[2 * i], (fan_out, fan_in),
                               minval=-bound, maxval=bound, dtype=jnp.float32)
        b = jax.random.uniform(keys[2 * i + 1], (fan_out,),
                               minval=-bound, maxval=bound, dtype=jnp.float32)
        params[f"w{i + 1}"] = w
        params[f"b{i + 1}"] = b
    return params


def reference_forward(x, params, quantize_bf16=False):
    """Pure-JAX reference. If quantize_bf16, mimic the kernel's bf16 MXU inputs
    (f32 math on bf16-rounded operands) for a tight numerical check."""
    def q(a):
        return a.astype(jnp.bfloat16).astype(jnp.float32) if quantize_bf16 else a
    h = jnp.maximum(q(x) @ q(params["w1"]).T + params["b1"], 0.0)
    h = jnp.maximum(q(h) @ q(params["w2"]).T + params["b2"], 0.0)
    return h @ params["w3"].T + params["b3"]


if __name__ == "__main__":
    key = jax.random.PRNGKey(0)
    k_x, k_p = jax.random.split(key)

    batch = 300          # non-multiple of the tile -> exercises padding
    in_features = 8      # X_train_tensor.shape[1]

    x = jax.random.normal(k_x, (batch, in_features), dtype=jnp.float32)
    params = init_params(k_p, in_features)

    # Small tile in the test so the grid has >1 step; production default is 1024.
    out = water_consumption_nn(x, params, tile_b=128)
    out = jax.block_until_ready(out)
    assert out.shape == (batch, 1)

    # Tight check vs bf16-quantized reference (same operand rounding as kernel).
    ref_q = reference_forward(x, params, quantize_bf16=True)
    assert jnp.allclose(out, ref_q, atol=1e-3, rtol=1e-3), "mismatch vs bf16-quantized reference"

    # Loose check vs full-f32 reference (bf16 MXU inputs => relaxed tolerance).
    ref = reference_forward(x, params)
    assert jnp.allclose(out, ref, atol=5e-2, rtol=5e-2), "mismatch vs f32 reference"

    print("KERNEL_OK")
</pallas_src>

<mosaic_0001>
module attributes {stable_mosaic.version = 11 : i64} {
  func.func @mlp_kernel(%arg0: i32, %arg1: memref<8x128xbf16, #tpu.memory_space<vmem>>, %arg2: memref<64x8xbf16, #tpu.memory_space<vmem>>, %arg3: memref<64x1xf32, #tpu.memory_space<vmem>>, %arg4: memref<32x64xbf16, #tpu.memory_space<vmem>>, %arg5: memref<32x1xf32, #tpu.memory_space<vmem>>, %arg6: memref<32x1xf32, #tpu.memory_space<vmem>>, %arg7: memref<1x1xf32, #tpu.memory_space<vmem>>, %arg8: memref<1x128xf32, #tpu.memory_space<vmem>>) attributes {dimension_semantics = [#tpu.dimension_semantics<parallel>], iteration_bounds = array<i64: 3>, scalar_prefetch = 0 : i64, scratch_operands = 0 : i64, tpu.core_type = #tpu.core_type<tc>, window_params = [{transform_indices = @transform_0, window_bounds = array<i64: 8, 128>}, {pipeline_mode = #tpu.pipeline_mode<synchronous>, transform_indices = @transform_1, window_bounds = array<i64: 64, 8>}, {pipeline_mode = #tpu.pipeline_mode<synchronous>, transform_indices = @transform_2, window_bounds = array<i64: 64, 1>}, {pipeline_mode = #tpu.pipeline_mode<synchronous>, transform_indices = @transform_3, window_bounds = array<i64: 32, 64>}, {pipeline_mode = #tpu.pipeline_mode<synchronous>, transform_indices = @transform_4, window_bounds = array<i64: 32, 1>}, {pipeline_mode = #tpu.pipeline_mode<synchronous>, transform_indices = @transform_5, window_bounds = array<i64: 32, 1>}, {pipeline_mode = #tpu.pipeline_mode<synchronous>, transform_indices = @transform_6, window_bounds = array<i64: 1, 1>}, {transform_indices = @transform_7, window_bounds = array<i64: 1, 128>}]} {
    %c0 = arith.constant 0 : index
    %c0_0 = arith.constant 0 : index
    %0 = vector.load %arg2[%c0, %c0_0] : memref<64x8xbf16, #tpu.memory_space<vmem>>, vector<64x8xbf16>
    %c0_1 = arith.constant 0 : index
    %c0_2 = arith.constant 0 : index
    %1 = vector.load %arg1[%c0_1, %c0_2] : memref<8x128xbf16, #tpu.memory_space<vmem>>, vector<8x128xbf16>
    %cst = arith.constant dense<0.000000e+00> : vector<64x128xf32>
    %2 = tpu.matmul %0, %1, %cst {dimension_numbers = #tpu.dot_dimension_numbers<[1], [0], [0], [1], [0, 0, 1, 1], [], []>} : vector<64x8xbf16>, vector<8x128xbf16>, vector<64x128xf32> -> vector<64x128xf32>
    %c0_3 = arith.constant 0 : index
    %c0_4 = arith.constant 0 : index
    %3 = vector.load %arg3[%c0_3, %c0_4] : memref<64x1xf32, #tpu.memory_space<vmem>>, vector<64x1xf32>
    %4 = vector.broadcast %3 : vector<64x1xf32> to vector<64x128xf32>
    %5 = arith.addf %2, %4 : vector<64x128xf32>
    %cst_5 = arith.constant 0.000000e+00 : f32
    %6 = vector.broadcast %cst_5 : f32 to vector<64x128xf32>
    %7 = arith.maximumf %5, %6 : vector<64x128xf32>
    %c0_6 = arith.constant 0 : index
    %c0_7 = arith.constant 0 : index
    %8 = vector.load %arg4[%c0_6, %c0_7] : memref<32x64xbf16, #tpu.memory_space<vmem>>, vector<32x64xbf16>
    %9 = arith.truncf %7 : vector<64x128xf32> to vector<64x128xbf16>
    %cst_8 = arith.constant dense<0.000000e+00> : vector<32x128xf32>
    %10 = tpu.matmul %8, %9, %cst_8 {dimension_numbers = #tpu.dot_dimension_numbers<[1], [0], [0], [1], [0, 0, 1, 1], [], []>} : vector<32x64xbf16>, vector<64x128xbf16>, vector<32x128xf32> -> vector<32x128xf32>
    %c0_9 = arith.constant 0 : index
    %c0_10 = arith.constant 0 : index
    %11 = vector.load %arg5[%c0_9, %c0_10] : memref<32x1xf32, #tpu.memory_space<vmem>>, vector<32x1xf32>
    %12 = vector.broadcast %11 : vector<32x1xf32> to vector<32x128xf32>
    %13 = arith.addf %10, %12 : vector<32x128xf32>
    %cst_11 = arith.constant 0.000000e+00 : f32
    %14 = vector.broadcast %cst_11 : f32 to vector<32x128xf32>
    %15 = arith.maximumf %13, %14 : vector<32x128xf32>
    %c0_12 = arith.constant 0 : index
    %c0_13 = arith.constant 0 : index
    %16 = vector.load %arg6[%c0_12, %c0_13] : memref<32x1xf32, #tpu.memory_space<vmem>>, vector<32x1xf32>
    %17 = vector.broadcast %16 : vector<32x1xf32> to vector<32x128xf32>
    %18 = arith.mulf %17, %15 : vector<32x128xf32>
    %cst_14 = arith.constant dense<0.000000e+00> : vector<128xf32>
    %19 = vector.multi_reduction <add>, %18, %cst_14 [0] : vector<32x128xf32> to vector<128xf32>
    %20 = vector.shape_cast %19 : vector<128xf32> to vector<1x128xf32>
    %c0_15 = arith.constant 0 : index
    %c0_16 = arith.constant 0 : index
    %21 = vector.load %arg7[%c0_15, %c0_16] : memref<1x1xf32, #tpu.memory_space<vmem>>, vector<1x1xf32>
    %22 = vector.broadcast %21 : vector<1x1xf32> to vector<1x128xf32>
    %23 = arith.addf %20, %22 : vector<1x128xf32>
    %c0_17 = arith.constant 0 : index
    %c0_18 = arith.constant 0 : index
    %24 = vector.load %arg8[%c0_17, %c0_18] : memref<1x128xf32, #tpu.memory_space<vmem>>, vector<1x128xf32>
    tpu.vector_store %arg8[%c0_17, %c0_18], %23 {strides = array<i32>} : memref<1x128xf32, #tpu.memory_space<vmem>>, vector<1x128xf32>,
    return
  }
  func.func @transform_0(%arg0: i32) -> (i32, i32) {
    %c0_i32 = arith.constant 0 : i32
    %c0_i32_0 = arith.constant 0 : i32
    return %c0_i32, %arg0 : i32, i32
  }
  func.func @transform_1(%arg0: i32) -> (i32, i32) {
    %c0_i32 = arith.constant 0 : i32
    %c0_i32_0 = arith.constant 0 : i32
    %c0_i32_1 = arith.constant 0 : i32
    return %c0_i32, %c0_i32_0 : i32, i32
  }
  func.func @transform_2(%arg0: i32) -> (i32, i32) {
    %c0_i32 = arith.constant 0 : i32
    %c0_i32_0 = arith.constant 0 : i32
    %c0_i32_1 = arith.constant 0 : i32
    return %c0_i32, %c0_i32_0 : i32, i32
  }
  func.func @transform_3(%arg0: i32) -> (i32, i32) {
    %c0_i32 = arith.constant 0 : i32
    %c0_i32_0 = arith.constant 0 : i32
    %c0_i32_1 = arith.constant 0 : i32
    return %c0_i32, %c0_i32_0 : i32, i32
  }
  func.func @transform_4(%arg0: i32) -> (i32, i32) {
    %c0_i32 = arith.constant 0 : i32
    %c0_i32_0 = arith.constant 0 : i32
    %c0_i32_1 = arith.constant 0 : i32
    return %c0_i32, %c0_i32_0 : i32, i32
  }
  func.func @transform_5(%arg0: i32) -> (i32, i32) {
    %c0_i32 = arith.constant 0 : i32
    %c0_i32_0 = arith.constant 0 : i32
    %c0_i32_1 = arith.constant 0 : i32
    return %c0_i32, %c0_i32_0 : i32, i32
  }
  func.func @transform_6(%arg0: i32) -> (i32, i32) {
    %c0_i32 = arith.constant 0 : i32
    %c0_i32_0 = arith.constant 0 : i32
    %c0_i32_1 = arith.constant 0 : i32
    return %c0_i32, %c0_i32_0 : i32, i32
  }
  func.func @transform_7(%arg0: i32) -> (i32, i32) {
    %c0_i32 = arith.constant 0 : i32
    %c0_i32_0 = arith.constant 0 : i32
    return %c0_i32, %arg0 : i32, i32
  }
}

</mosaic_0001>

<bundles_post_ra>
// kernel: water_consumption_nn.1
= control target key start
LH: loop header
LB: loop body
LE: loop exit
PB: predicated region body
PF: predicated region fallthrough
CT: control target
= control target key end

     0   :  { %s763_s26 = smov 0   ;;  %s856_s0 = inlined_call_operand.vmem [shape: bf16[8,384], index: 0, kind: input, shape index: {}]   ;;  %s857_s1 = inlined_call_operand.vmem [shape: bf16[64,8], index: 1, kind: input, shape index: {}]   ;;  %s858_s2 = inlined_call_operand.vmem [shape: f32[64,1], index: 2, kind: input, shape index: {}]   ;;  %s859_s3 = inlined_call_operand.vmem [shape: bf16[32,64], index: 3, kind: input, shape index: {}]   ;;  %s860_s4 = inlined_call_operand.vmem [shape: f32[32,1], index: 4, kind: input, shape index: {}]   ;;  %s861_s5 = inlined_call_operand.vmem [shape: f32[32,1], index: 5, kind: input, shape index: {}]   ;;  %s862_s6 = inlined_call_operand.<no memory space> [shape: f32[1,1], index: 6, kind: input, shape index: {}]   ;;  %s863_s7 = inlined_call_operand.vmem [shape: f32[1,384], index: 7, kind: output, shape index: {}]  }
   0x1   :  { %v12_v0 = vstv %s862_s6 }
   0x2   :  { %13 = vst [vmem:[#allocation2] sm:$0x1] %v12_v0 }
   0x3 LB: > { %s640_s27 = sadd.s32 4294967295, %s717_s26   ;;  %p644_p0 = scmp.ge.s32.totalorder %s717_s26, 1  ;;  %s717_s26 = sphi %s763_s26, %s19_s26  }
   0x4   : > { %p238_p1 = scmp.lt.s32.totalorder %s717_s26, 4 }
   0x6   : > { %p239_p2 = pnand %p644_p0, %p238_p1 }
   0x7   : > { %p267_p3 = scmp.lt.s32.totalorder (!%p239_p2), %s640_s27, 2  ;;  %v705_v1 = vld [vmem:[%s857_s1] sm:$0xff] (!%p239_p2)   ;;  %vm352_vm0 = vcmask (!%p239_p2), 64512   ;;  %vm365_vm1 = vcmask (!%p239_p2), 1043456   ;;  %v719_v2 = vmov (!%p239_p2), 0   ;;  %v286_v4 = vld [vmem:[%s858_s2 + $0x10] sm:$0xff] (!%p239_p2) }
   0x8   : > { %242 = sbr.rel (%p239_p2) target bundleno = 502 (0x1f6), region = 48  ;;  %673 = vmatprep.mubr.msk.bf16.mxu0 (!%p239_p2), %vm352_vm0, %v705_v1  ;;  %703 = vset.pattern.permute.xlu0 (!%p239_p2), %v719_v2  ;;  %v284_v3 = vld [vmem:[%s858_s2] sm:$0xff] (!%p239_p2)  ;;  %v285_v6 = vld [vmem:[%s858_s2 + $0x8] sm:$0xff] (!%p239_p2)  ;;  %v287_v9 = vld [vmem:[%s858_s2 + $0x18] sm:$0xff] (!%p239_p2)  ;;  %vm484_vm2 = vcmask (!%p239_p2), 523264  }
   0x9   : > { %704 = vset.pattern.permute.xlu1 (!%p239_p2), %v719_v2  ;;  %294 = vperm.xlu0 (!%p239_p2), %703, %v284_v3   ;;  %v706_v8 = vld [vmem:[%s857_s1 + $0x8] sm:$0xff] (!%p239_p2)   ;;  %v707_v10 = vld [vmem:[%s857_s1 + $0x10] sm:$0xff] (!%p239_p2)   ;;  %v288_v11 = vld [vmem:[%s858_s2 + $0x20] sm:$0xff] (!%p239_p2) }
   0xa   : > { %304 = vperm.xlu1 (!%p239_p2), %704, %v286_v4   ;;  %v289_v12 = vld [vmem:[%s858_s2 + $0x28] sm:$0xff] (!%p239_p2)  ;;  %v290_v13 = vld [vmem:[%s858_s2 + $0x30] sm:$0xff] (!%p239_p2)  ;;  %v708_v14 = vld [vmem:[%s857_s1 + $0x18] sm:$0xff] (!%p239_p2)  }
   0xb   : > { %v291_v15 = vld [vmem:[%s858_s2 + $0x38] sm:$0xff] (!%p239_p2)  ;;  %v450_v16 = vld [vmem:[%s860_s4] sm:$0xff] (!%p239_p2)  ;;  %v451_v17 = vld [vmem:[%s860_s4 + $0x8] sm:$0xff] (!%p239_p2) }
   0xc   : > { %v452_v18 = vld [vmem:[%s860_s4 + $0x10] sm:$0xff] (!%p239_p2)  ;;  %v453_v19 = vld [vmem:[%s860_s4 + $0x18] sm:$0xff] (!%p239_p2)  ;;  %v544_v20 = vld [vmem:[%s861_s5] sm:$0xff] (!%p239_p2) }
   0xd   : > { %299 = vperm.xlu0 (!%p239_p2), %703, %v285_v6   ;;  %v545_v21 = vld [vmem:[%s861_s5 + $0x8] sm:$0xff] (!%p239_p2)  ;;  %v546_v22 = vld [vmem:[%s861_s5 + $0x10] sm:$0xff] (!%p239_p2)  ;;  %v547_v23 = vld [vmem:[%s861_s5 + $0x18] sm:$0xff] (!%p239_p2) }
   0xe   : > { %309 = vperm.xlu1 (!%p239_p2), %704, %v287_v9   ;;  %v581_v24 = vld [vmem:[#allocation2] sm:$0x1] (!%p239_p2)  ;;  %v710_v62 = vld [vmem:[%s859_s3 + $0x8] sm:$0xff] (!%p239_p2)  }
   0xf   : > { %s865_s27 = smov (!%p267_p3, %s640_s27), 2  ;;  %v709_v25 = vld [vmem:[%s859_s3] sm:$0xff]  }
  0x10   : > { %s645_s6 = sshll.u32 %s865_s27, 2  ;;  %689 = vmatprep.mubr.msk.bf16.mxu1 %vm484_vm2, %v709_v25  ;;  %v587_v25 = vlaneseq  ;;  %s273_s10 = scalar_lea.vmem %s863_s7, %s865_s27 }
  0x11   : > { %s270_s11 = scalar_lea.vmem %s856_s0, %s645_s6  ;;  %314 = vperm.xlu0 %703, %v288_v11  }
  0x12   : > { %v283_v5 = vld [vmem:[%s270_s11] sm:$0xf]  ;;  %319 = vperm.xlu1 %704, %v289_v12  }
  0x13   : > { %693 = vmatprep.subr.msk.bf16.mxu0 %vm365_vm1, %v283_v5  ;;  %v367_v7 = vsel %vm365_vm1, %v283_v5, 0 }
  0x14   : > { %672 = vmatpush3.bf16.msra.mxu0 %v367_v7 }
  0x15   : > { %324 = vperm.xlu0 %703, %v290_v13  }
  0x16   : > { %329 = vperm.xlu1 %704, %v291_v15  }
  0x17   : > { %674 = vmatmul.mubr.msk.bf16.vlgmr.msra.gmra.mrb[0].mxu0 %vm352_vm0, %v706_v8 }
  0x18   : > { %677 = vmatprep.mubr.msk.bf16.mxu0 %vm352_vm0, %v707_v10 }
  0x19   : > { %456 = vperm.xlu0 %703, %v450_v16  }
  0x1a   : > { %461 = vperm.xlu1 %704, %v451_v17  }
  0x1d   : > { %466 = vperm.xlu0 %703, %v452_v18  }
  0x1e   : > { %471 = vperm.xlu1 %704, %v453_v19  }
  0x1f   : > { %678 = vmatmul.mubr.msk.bf16.gmra.mrb[4].mxu0 %vm352_vm0, %v708_v14 }
  0x21   : > { %550 = vperm.xlu0 %703, %v544_v20  }
  0x22   : > { %555 = vperm.xlu1 %704, %v545_v21  }
  0x25   : > { %560 = vperm.xlu0 %703, %v546_v22  }
  0x26   : > { %565 = vperm.xlu1 %704, %v547_v23  }
  0x29   : > { %584 = vperm.xlu0 %703, %v581_v24  }
  0x88   : > { %v295_v26 = vpop.permute.xlu0 %294 }
  0x89   : > { %v305_v27 = vpop.permute.xlu1 %304 }
  0x8c   : > { %v300_v28 = vpop.permute.xlu0 %299 }
  0x8d   : > { %v310_v29 = vpop.permute.xlu1 %309 }
  0x90   : > { %v315_v33 = vpop.permute.xlu0 %314 }
  0x91   : > { %v320_v38 = vpop.permute.xlu1 %319 }
  0x94   : > { %v325_v45 = vpop.permute.xlu0 %324 }
  0x95   : > { %v330_v50 = vpop.permute.xlu1 %329 }
  0x98   : > { %v457_v63 = vpop.permute.xlu0 %456 }
  0x99   : > { %v462_v0 = vpop.permute.xlu1 %461 }
  0x9c   : > { %v467_v1 = vpop.permute.xlu0 %466 }
  0x9d   : > { %v472_v2 = vpop.permute.xlu1 %471 }
  0xa0   : > { %v551_v8 = vpop.permute.xlu0 %550 }
  0xa1   : > { %v556_v13 = vpop.permute.xlu1 %555 }
  0xa4   : > { %v561_v19 = vpop.permute.xlu0 %560 }
  0xa5   : > { %v566_v22 = vpop.permute.xlu1 %565 }
  0xea   : > { %v675_v30 = vpop.f32.mrb[0].mxu0 }
  0xeb   : > { %v412_v31 = vadd.f32 %v675_v30, %v305_v27  ;;  %v403_v32 = vpop.f32.mrb[1].mxu0 }
  0xec   : > { %v404_v34 = vadd.f32 %v403_v32, %v295_v26  ;;  %v676_v35 = vpop.f32.mrb[2].mxu0 }
  0xed   : > { %v415_v36 = vadd.f32 %v676_v35, %v310_v29  ;;  %v406_v37 = vpop.f32.mrb[3].mxu0  ;;  %v436_v40 = vmax.f32 %v412_v31, 0.0 }
  0xee   : > { %v407_v39 = vadd.f32 %v406_v37, %v300_v28  ;;  %v434_v42 = vmax.f32 %v404_v34, 0.0  ;;  %v588_v28 = vshrl.u32 %v587_v25, 7 }
  0xef   : > { %v437_v41 = vmax.f32 %v415_v36, 0.0 }
  0xf0   : > { %v435_v43 = vmax.f32 %v407_v39, 0.0  ;;  %v589_v31 = vsub.s32 0, %v588_v28 }
  0xf1   : > { %v447_v44 = vpack.c.bf16 %v437_v41, %v436_v40 }
  0xf2   : > { %v679_v46 = vpop.f32.mrb[4].mxu0  ;;  %v446_v47 = vpack.c.bf16 %v435_v43, %v434_v42 }
  0xf3   : > { %v428_v48 = vadd.f32 %v679_v46, %v325_v45  ;;  %v419_v49 = vpop.f32.mrb[5].mxu0 }
  0xf4   : > { %v420_v51 = vadd.f32 %v419_v49, %v315_v33  ;;  %v680_v52 = vpop.f32.mrb[6].mxu0  ;;  %681 = vmatprep.subr.bf16.mxu1 %v446_v47  ;;  %v585_v33 = vpop.permute.xlu0 %584 }
  0xf5   : > { %v431_v53 = vadd.f32 %v680_v52, %v330_v50  ;;  %v422_v54 = vpop.f32.mrb[7].mxu0  ;;  %682 = vmatpush3.bf16.msra.mxu1 %v446_v47  ;;  %v440_v56 = vmax.f32 %v428_v48, 0.0  ;;  %v590_v35 = vrot.slane %v585_v33, %v589_v31 }
  0xf6   : > { %v423_v55 = vadd.f32 %v422_v54, %v320_v38  ;;  %683 = vmatprep.subr.bf16.mxu1 %v447_v44  ;;  %v438_v58 = vmax.f32 %v420_v51, 0.0 }
  0xf7   : > { %v441_v57 = vmax.f32 %v431_v53, 0.0 }
  0xf8   : > { %v439_v59 = vmax.f32 %v423_v55, 0.0 }
  0xf9   : > { %v449_v60 = vpack.c.bf16 %v441_v57, %v440_v56  ;;  %684 = vmatpush3.bf16.msra.mxu1 %v447_v44 }
  0xfa   : > { %v448_v61 = vpack.c.bf16 %v439_v59, %v438_v58 }
  0xfc   : > { %685 = vmatprep.subr.bf16.mxu1 %v448_v61 }
  0xfd   : > { %686 = vmatpush3.bf16.msra.mxu1 %v448_v61 }
  0xfe   : > { %687 = vmatprep.subr.bf16.mxu1 %v449_v60 }
 0x101   : > { %688 = vmatpush3.bf16.msra.mxu1 %v449_v60 }
 0x104   : > { %690 = vmatmul.mubr.msk.bf16.vlgmr.msra.gmra.mrb[0].mxu1 %vm484_vm2, %v710_v62 }
 0x1d7   : > { %v691_v3 = vpop.f32.mrb[0].mxu1 }
 0x1d8   : > { %v525_v4 = vpop.f32.mrb[1].mxu1  ;;  %v534_v5 = vadd.f32 %v691_v3, %v467_v1 }
 0x1d9   : > { %v526_v6 = vadd.f32 %v525_v4, %v457_v63  ;;  %v692_v7 = vpop.f32.mrb[2].mxu1 }
 0x1da   : > { %v528_v9 = vpop.f32.mrb[3].mxu1  ;;  %v537_v11 = vadd.f32 %v692_v7, %v472_v2  ;;  %v542_v14 = vmax.f32 %v534_v5, 0.0 }
 0x1db   : > { %v540_v10 = vmax.f32 %v526_v6, 0.0  ;;  %v529_v12 = vadd.f32 %v528_v9, %v462_v0 }
 0x1dc   : > { %v543_v17 = vmax.f32 %v537_v11, 0.0  ;;  %v570_v20 = vmul.f32 %v561_v19, %v542_v14 }
 0x1dd   : > { %v541_v15 = vmax.f32 %v529_v12, 0.0  ;;  %v568_v16 = vmul.f32 %v551_v8, %v540_v10 }
 0x1de   : > { %v571_v23 = vmul.f32 %v566_v22, %v543_v17 }
 0x1df   : > { %v569_v18 = vmul.f32 %v556_v13, %v541_v15 }
 0x1e1   : > { %v572_v21 = vadd.f32 %v569_v18, %v568_v16 }
 0x1e3   : > { %v573_v24 = vadd.f32 %v572_v21, %v570_v20 }
 0x1e5   : > { %v574_v26 = vadd.f32 %v573_v24, %v571_v23 }
 0x1e7   : > { %v575_v27 = vrot.slane %v574_v26, 4 }
 0x1e9   : > { %v576_v29 = vadd.f32 %v575_v27, %v574_v26 }
 0x1eb   : > { %v577_v30 = vrot.slane %v576_v29, 2 }
 0x1ed   : > { %v578_v32 = vadd.f32 %v577_v30, %v576_v29 }
 0x1ef   : > { %v579_v34 = vrot.slane %v578_v32, 1 }
 0x1f1   : > { %v580_v36 = vadd.f32 %v579_v34, %v578_v32 }
 0x1f3   : > { %v591_v37 = vadd.f32 %v590_v35, %v580_v36 }
 0x1f5   : > { %592 = vst [vmem:[%s273_s10] sm:$0x1] %v591_v37 }
 0x1f6 PF: > { %s19_s26 = sadd.s32 1, %s717_s26  }
 0x1f7   : > { %p16_p4 = scmp.ge.s32.totalorder %s19_s26, 5  }
 0x1f9   :  { %18 = sbr.rel (!%p16_p4) target bundleno = 3 (0x3), region = 78 }

</bundles_post_ra>
